<compile_context>
chip_gen: v7x
topology: tpu7x:2x2x1
jax: 0.10.0
libtpu: 0.0.40
codegen_flags: <defaults>
</compile_context>

<pallas_src>
import functools

import jax
import jax.numpy as jnp
from jax.experimental import pallas as pl
from jax.experimental.pallas import tpu as pltpu

_LANE = 128
_BLOCK_B_MAX = 1024
_NEG_BIG = -1e30  # Python float, used only in the wrapper (never captured by the kernel)


def _round_up(x, m):
    return (x + m - 1) // m * m


def _classifier_logsoftmax_kernel(x_ref, w_ref, b_ref, o_ref):
    # x_ref: [bB, H] bf16    w_ref: [Lp, H] bf16 (PyTorch Linear layout, label-padded)
    # b_ref: [1, Lp] f32 (padded lanes pre-set to -1e30)    o_ref: [bB, Lp] f32
    x = x_ref[...]
    w = w_ref[...]
    b = b_ref[...]

    # Linear layer: contract on H (axis 1 of both operands) -> [bB, Lp].
    # bf16 operands on the MXU, f32 accumulation. Padded weight rows are zero, so the
    # padded logit lanes equal the padded bias lanes (= -1e30) and drop out of the
    # max / exp-sum below with no explicit masking.
    logits = jax.lax.dot_general(
        x, w,
        dimension_numbers=(((1,), (1,)), ((), ())),
        preferred_element_type=jnp.float32,
    ) + b

    # Numerically stable log_softmax over the label axis (dim=1 in PyTorch terms),
    # all in f32 on the VPU/EUP/XLU.
    m = jnp.max(logits, axis=-1, keepdims=True)                  # [bB, 1]
    shifted = logits - m                                         # [bB, Lp]
    sum_exp = jnp.sum(jnp.exp(shifted), axis=-1, keepdims=True)  # [bB, 1]
    o_ref[...] = (shifted - jnp.log(sum_exp)).astype(o_ref.dtype)


def pad_classifier_params(weight, bias, in_dtype=jnp.bfloat16):
    """Pad the classifier params once (hoist out of the serving loop).

    weight: [L, H] (PyTorch Linear layout), bias: [L].
    Returns (w_p [Lp, H] in_dtype, b_p [1, Lp] f32) with the label axis padded to a
    multiple of 128 lanes; padded bias lanes are -1e30 so padded logits never win the
    max and contribute exp(..) == 0 to the softmax denominator.
    """
    L, H = weight.shape
    Lp = pl.cdiv(L, _LANE) * _LANE
    w_p = jnp.zeros((Lp, H), in_dtype).at[:L, :].set(weight.astype(in_dtype))
    b_p = jnp.full((1, Lp), _NEG_BIG, jnp.float32).at[0, :L].set(bias.astype(jnp.float32))
    return w_p, b_p


@functools.partial(jax.jit, static_argnames=("num_labels", "block_b"))
def bert_sent_classifier_forward(x, w_p, b_p, *, num_labels, block_b=None):
    """x: [B, H] float; w_p/b_p from pad_classifier_params. Returns [B, num_labels] f32."""
    B, H = x.shape
    Lp = w_p.shape[0]
    if block_b is None:
        block_b = _BLOCK_B_MAX

    # bf16 at the HBM boundary: the x read dominates HBM traffic for this kernel.
    x = x.astype(w_p.dtype)

    if B <= block_b:
        # Whole problem fits trivially in VMEM: no grid, no pipeline machinery.
        out = pl.pallas_call(
            _classifier_logsoftmax_kernel,
            out_shape=jax.ShapeDtypeStruct((B, Lp), jnp.float32),
            in_specs=[
                pl.BlockSpec(memory_space=pltpu.MemorySpace.VMEM),
                pl.BlockSpec(memory_space=pltpu.MemorySpace.VMEM),
                pl.BlockSpec(memory_space=pltpu.MemorySpace.VMEM),
            ],
            out_specs=pl.BlockSpec(memory_space=pltpu.MemorySpace.VMEM),
        )(x, w_p, b_p)
    else:
        # Serving-size batches: tile ONLY the batch axis; weight/bias stay resident
        # (constant index_map). Guarantee >= 2 grid steps so the "parallel" batch axis
        # can shard across both v7x TensorCores; keep tiles sublane-aligned (mult. of 8)
        # and capped at 1024 rows (well inside every generation's scoped VMEM budget).
        bb = min(block_b, _round_up(pl.cdiv(B, 2), 8))
        out = pl.pallas_call(
            _classifier_logsoftmax_kernel,
            out_shape=jax.ShapeDtypeStruct((B, Lp), jnp.float32),
            grid=(pl.cdiv(B, bb),),
            in_specs=[
                pl.BlockSpec((bb, H), lambda i: (i, 0)),
                pl.BlockSpec((Lp, H), lambda i: (0, 0)),
                pl.BlockSpec((1, Lp), lambda i: (0, 0)),
            ],
            out_specs=pl.BlockSpec((bb, Lp), lambda i: (i, 0)),
            compiler_params=pltpu.CompilerParams(
                dimension_semantics=("parallel",),
            ),
        )(x, w_p, b_p)

    # Free layout plumbing: drop the padded label lanes (fuses under this jit).
    return out[:, :num_labels]


def _reference(x, weight, bias):
    logits = x @ weight.T + bias
    return jax.nn.log_softmax(logits, axis=1)


if __name__ == "__main__":
    H, L = 128, 4
    key = jax.random.PRNGKey(0)
    kx, kw, kb, kx2 = jax.random.split(key, 4)

    # PyTorch Linear layout: weight [L, H], bias [L].
    weight = jax.random.normal(kw, (L, H), dtype=jnp.float32) * 0.02
    bias = jax.random.normal(kb, (L,), dtype=jnp.float32) * 0.01

    # Pad / cast the params once (hoisted out of the per-call path).
    w_p, b_p = pad_classifier_params(weight, bias)

    # Path 1: small batch -> single un-gridded VMEM-resident call.
    B_small = 8
    x_small = jax.random.normal(kx, (B_small, H), dtype=jnp.float32)
    out_small = jax.block_until_ready(
        bert_sent_classifier_forward(x_small, w_p, b_p, num_labels=L)
    )
    ref_small = _reference(x_small, weight, bias)
    assert out_small.shape == (B_small, L)
    # bf16 inputs -> relaxed tolerance vs. the f32 reference.
    assert jnp.allclose(out_small, ref_small, atol=2e-2, rtol=2e-2), "small-batch mismatch"
    assert jnp.allclose(jnp.exp(out_small).sum(-1), 1.0, atol=1e-3), "rows not normalized"

    # Path 2: larger batch -> batch-tiled grid with resident weight/bias.
    # (block_b forced small here only to exercise the grid at test shapes;
    #  the production default is block_b=1024.)
    B_big = 256
    x_big = jax.random.normal(kx2, (B_big, H), dtype=jnp.float32)
    out_big = jax.block_until_ready(
        bert_sent_classifier_forward(x_big, w_p, b_p, num_labels=L, block_b=64)
    )
    ref_big = _reference(x_big, weight, bias)
    assert out_big.shape == (B_big, L)
    assert jnp.allclose(out_big, ref_big, atol=2e-2, rtol=2e-2), "tiled-batch mismatch"

    print("KERNEL_OK")
</pallas_src>

<mosaic_0001>
module attributes {stable_mosaic.version = 11 : i64} {
  func.func @_classifier_logsoftmax_kernel(%arg0: memref<8x128xbf16, #tpu.memory_space<vmem>>, %arg1: memref<128x128xbf16, #tpu.memory_space<vmem>>, %arg2: memref<1x128xf32, #tpu.memory_space<vmem>>, %arg3: memref<8x128xf32, #tpu.memory_space<vmem>>) attributes {dimension_semantics = [], scalar_prefetch = 0 : i64, scratch_operands = 0 : i64, tpu.core_type = #tpu.core_type<tc>} {
    %c0 = arith.constant 0 : index
    %c0_0 = arith.constant 0 : index
    %0 = vector.load %arg0[%c0, %c0_0] : memref<8x128xbf16, #tpu.memory_space<vmem>>, vector<8x128xbf16>
    %c0_1 = arith.constant 0 : index
    %c0_2 = arith.constant 0 : index
    %1 = vector.load %arg1[%c0_1, %c0_2] : memref<128x128xbf16, #tpu.memory_space<vmem>>, vector<128x128xbf16>
    %c0_3 = arith.constant 0 : index
    %c0_4 = arith.constant 0 : index
    %2 = vector.load %arg2[%c0_3, %c0_4] : memref<1x128xf32, #tpu.memory_space<vmem>>, vector<1x128xf32>
    %cst = arith.constant dense<0.000000e+00> : vector<8x128xf32>
    %3 = tpu.matmul %0, %1, %cst {dimension_numbers = #tpu.dot_dimension_numbers<[1], [1], [0], [0], [0, 0, 1, 0], [], []>} : vector<8x128xbf16>, vector<128x128xbf16>, vector<8x128xf32> -> vector<8x128xf32>
    %4 = vector.broadcast %2 : vector<1x128xf32> to vector<8x128xf32>
    %5 = arith.addf %3, %4 : vector<8x128xf32>
    %cst_5 = arith.constant dense<0xFF800000> : vector<8xf32>
    %6 = vector.multi_reduction <maximumf>, %5, %cst_5 [1] : vector<8x128xf32> to vector<8xf32>
    %7 = vector.shape_cast %6 : vector<8xf32> to vector<8x1xf32>
    %8 = vector.broadcast %7 : vector<8x1xf32> to vector<8x128xf32>
    %9 = arith.subf %5, %8 : vector<8x128xf32>
    %10 = math.exp %9 : vector<8x128xf32>
    %cst_6 = arith.constant dense<0.000000e+00> : vector<8xf32>
    %11 = vector.multi_reduction <add>, %10, %cst_6 [1] : vector<8x128xf32> to vector<8xf32>
    %12 = vector.shape_cast %11 : vector<8xf32> to vector<8x1xf32>
    %13 = math.log %12 : vector<8x1xf32>
    %14 = vector.broadcast %13 : vector<8x1xf32> to vector<8x128xf32>
    %15 = arith.subf %9, %14 : vector<8x128xf32>
    %c0_7 = arith.constant 0 : index
    %c0_8 = arith.constant 0 : index
    %16 = vector.load %arg3[%c0_7, %c0_8] : memref<8x128xf32, #tpu.memory_space<vmem>>, vector<8x128xf32>
    tpu.vector_store %arg3[%c0_7, %c0_8], %15 {strides = array<i32>} : memref<8x128xf32, #tpu.memory_space<vmem>>, vector<8x128xf32>,
    return
  }
}

</mosaic_0001>

<bundles_post_ra>
// kernel: bert_sent_classifier_forward.1
= control target key start
LH: loop header
LB: loop body
LE: loop exit
PB: predicated region body
PF: predicated region fallthrough
CT: control target
= control target key end

     0   :  { %8 = vsyncpa [#allocation3], 0  ;;  %s236_s12 = smov [#allocation2]   ;;  %s282_s0 = inlined_call_operand.vmem [shape: bf16[8,128], index: 0, kind: input, shape index: {}]   ;;  %s283_s1 = inlined_call_operand.hbm [shape: bf16[128,128], index: 1, kind: input, shape index: {}]   ;;  %s284_s2 = inlined_call_operand.vmem [shape: f32[1,128], index: 2, kind: input, shape index: {}]   ;;  %s285_s3 = inlined_call_operand.vmem [shape: f32[8,128], index: 3, kind: output, shape index: {}]  }
   0x1   :  { %s16_s13 = sshll.u32 %s236_s12, 4  ;;  %s212_s16 = scalar_lea.hbm %s283_s1, 1024  ;;  %s17_s13 = int_to_ptr.vmem [resolvable:$true] %s16_s13 }
   0x2   :  { %p213_p0 = scmp.ne.s32.totalorder %s283_s1, %s212_s16  ;;  %p216_p1 = scmp.lt.u32.totalorder %s212_s16, %s283_s1 }
   0x4   :  { %p218_p2 = pnand %p216_p1, %p213_p0 }
   0x6   :  { %221 = shalt.err (!%p218_p2)
}
   0x7   :  { %s222_s21 = scalar_lea.vmem %s17_s13, 1024  ;;  %p227_p4 = scmp.lt.s32.totalorder %s17_s13, %s17_s13 }
   0x8   :  { %p223_p3 = scmp.ne.s32.totalorder %s17_s13, %s222_s21  ;;  %p228_p5 = scmp.lt.s32.totalorder %s222_s21, %s222_s21 }
   0xa   :  { %p229_p6 = por %p228_p5, %p227_p4 }
   0xc   :  { %p230_p7 = pnand %p229_p6, %p223_p3 }
   0xe   :  { %233 = shalt.err (!%p230_p7)
}
   0xf   :  { %s237_s22 = smov 64   ;;  %s238_s23 = smov 4  }
  0x10   :  { %22 = dma.hbm_to_vmem [thread:$0]  %s283_s1, 1024, %s17_s13, [#allocation3], %s237_s22, %s237_s22, %s238_s23  }
  0x11   :  { %234 = dma.done.wait [#allocation3], 1024  }
  0x12   :  { %235 = vsyncadd [#allocation3], 4294966272  ;;  %v239_v0 = vmov 0.0   ;;  %vm240_vm0 = vmmov 0   ;;  %v200_v1 = vld [vmem:[#allocation2] sm:$0xff]   ;;  %v201_v2 = vld [vmem:[#allocation2 + $0x8] sm:$0xff]  }
  0x13   :  { %175 = vmatprep.subr.bf16.mxu0 %v239_v0  ;;  %191 = vmatprep.mubr.msk.bf16.mxu0 %vm240_vm0, %v239_v0  ;;  %v202_v3 = vld [vmem:[#allocation2 + $0x10] sm:$0xff]   ;;  %v203_v4 = vld [vmem:[#allocation2 + $0x18] sm:$0xff]   ;;  %v204_v5 = vld [vmem:[#allocation2 + $0x20] sm:$0xff]  }
  0x14   :  { %176 = vmatpush3.bf16.xpose.msra.mxu0 %v200_v1  ;;  %v205_v6 = vld [vmem:[#allocation2 + $0x28] sm:$0xff]   ;;  %v206_v7 = vld [vmem:[#allocation2 + $0x30] sm:$0xff]   ;;  %v207_v8 = vld [vmem:[#allocation2 + $0x38] sm:$0xff]  }
  0x15   :  { %177 = vmatprep.subr.bf16.mxu0 %v239_v0  ;;  %v29_v9 = vld [vmem:[%s282_s0] sm:$0xf] }
  0x16   :  { %v157_v10 = vld [vmem:[%s284_s2] ss:$0 sm:$0xff] }
  0x1c   :  { %178 = vmatpush3.bf16.xpose.msra.mxu0 %v201_v2 }
  0x1d   :  { %179 = vmatprep.subr.bf16.mxu0 %v239_v0 }
  0x24   :  { %180 = vmatpush3.bf16.xpose.msra.mxu0 %v202_v3 }
  0x25   :  { %181 = vmatprep.subr.bf16.mxu0 %v239_v0 }
  0x2c   :  { %182 = vmatpush3.bf16.xpose.msra.mxu0 %v203_v4 }
  0x2d   :  { %183 = vmatprep.subr.bf16.mxu0 %v239_v0 }
  0x34   :  { %184 = vmatpush3.bf16.xpose.msra.mxu0 %v204_v5 }
  0x35   :  { %185 = vmatprep.subr.bf16.mxu0 %v239_v0 }
  0x3c   :  { %186 = vmatpush3.bf16.xpose.msra.mxu0 %v205_v6 }
  0x3d   :  { %187 = vmatprep.subr.bf16.mxu0 %v239_v0 }
  0x44   :  { %188 = vmatpush3.bf16.xpose.msra.mxu0 %v206_v7 }
  0x45   :  { %189 = vmatprep.subr.bf16.mxu0 %v239_v0 }
  0x4c   :  { %190 = vmatpush3.bf16.xpose.msra.mxu0 %v207_v8 }
  0x53   :  { %192 = vmatmul.mubr.bf16.vlgmr.msra.gmra.mrb[0].mxu0 %v29_v9 }
 0x126   :  { %v135_v11 = vpop.f32.mrb[0].mxu0 }
 0x127   :  { %v136_v12 = vadd.f32 %v157_v10, %v135_v11  ;;  %v193_v13 = vpop.f32.mrb[1].mxu0 }
 0x128   :  { %v138_v14 = vpop.f32.mrb[2].mxu0 }
 0x129   :  { %141 = vmax.xlane.f32.xlu0 %v136_v12  ;;  %v194_v15 = vpop.f32.mrb[3].mxu0 }
 0x1b6   :  { %v142_v16 = vpop.xlane.xlu0 %141 }
 0x1b7   :  { %v143_v17 = vsub.f32 %v136_v12, %v142_v16 }
 0x1b9   :  { %v144_v18 = vmul.f32 1.442695, %v143_v17 }
 0x1bb   :  { %208 = vpow2.f32 %v144_v18 }
 0x1c5   :  { %v209_v19 = vpop.eup %208 }
 0x1c6   :  { %146 = vadd.xlane.f32.xlu0 %v209_v19 }
 0x253   :  { %v147_v20 = vpop.xlane.xlu0 %146 }
 0x254   :  { %210 = vlog2.f32 %v147_v20 }
 0x25e   :  { %v211_v21 = vpop.eup %210 }
 0x25f   :  { %v149_v22 = vmul.f32 0.6931472, %v211_v21 }
 0x261   :  { %v150_v23 = vsub.f32 %v143_v17, %v149_v22 }
 0x263   :  { %151 = vst [vmem:[%s285_s3] sm:$0xff] %v150_v23 }
 0x264   :  { %156 = vsyncpa [#allocation3], 1 }

</bundles_post_ra>
